<compile_context>
chip_gen: v5e
topology: v5e:2x2
jax: 0.10.0
libtpu: 0.0.40
codegen_flags: <defaults>
</compile_context>

<pallas_src>
import jax
import jax.numpy as jnp
from jax.experimental import pallas as pl
from jax.experimental.pallas import tpu as pltpu


NUM_CLASSES = 4
HIDDEN = 24
BN_EPS = 1e-5
LEAKY_SLOPE = 0.01
MAX_TILE_PX = 32768            # lane-axis pixel tile cap (multiple of 128)
OUT_DTYPE = jnp.bfloat16       # TODO(synk): jnp.float32 if downstream needs it


# ---------------------------------------------------------------------------
# Pallas kernel: fused 1x1-conv chain. Channels on sublanes, pixels lane-dense.
# ---------------------------------------------------------------------------
def _combine_kernel(a_ref, g_ref, w1a_ref, w1g_ref, b1_ref,
                    w2_ref, b2_ref, w3_ref, b3_ref, o_ref):
    # bf16 x bf16 matmuls on the MXU, f32 accumulation throughout.
    a = a_ref[...].astype(jnp.bfloat16)      # (C, T)  f32 -> bf16 (in-kernel)
    g = g_ref[...]                           # (C, T)  already bf16

    # conv1 (BN1 scale pre-folded into weights). Channel concat == sum of two
    # matmuls. Then BN1 bias + LeakyReLU(0.01).
    h = jnp.dot(w1a_ref[...], a, preferred_element_type=jnp.float32)
    h = h + jnp.dot(w1g_ref[...], g, preferred_element_type=jnp.float32)
    h = h + b1_ref[...]
    h = jnp.where(h >= 0.0, h, LEAKY_SLOPE * h).astype(jnp.bfloat16)

    # conv2 (BN2 scale pre-folded) + BN2 bias + LeakyReLU(0.01).
    h = jnp.dot(w2_ref[...], h, preferred_element_type=jnp.float32)
    h = h + b2_ref[...]
    h = jnp.where(h >= 0.0, h, LEAKY_SLOPE * h).astype(jnp.bfloat16)

    # conv3 (with bias).
    y = jnp.dot(w3_ref[...], h, preferred_element_type=jnp.float32)
    y = y + b3_ref[...]
    o_ref[...] = y.astype(o_ref.dtype)


def _run_pixel_mlp(alpha_f, gamma_f, params, tile_px):
    """alpha_f: (N, C, P) f32; gamma_f: (N, C, P) bf16."""
    n, c, p = alpha_f.shape
    w1a, w1g, b1, w2, b2, w3, b3 = params
    c_out = w3.shape[0]
    grid = (n, pl.cdiv(p, tile_px))          # partial last tile -> masked store

    pix_spec = pl.BlockSpec((None, c, tile_px), lambda b, i: (b, 0, i))
    out_spec = pl.BlockSpec((None, c_out, tile_px), lambda b, i: (b, 0, i))
    full2d = lambda b, i: (0, 0)  # noqa: E731 — broadcast weights to every tile

    return pl.pallas_call(
        _combine_kernel,
        out_shape=jax.ShapeDtypeStruct((n, c_out, p), OUT_DTYPE),
        grid_spec=pltpu.PrefetchScalarGridSpec(
            num_scalar_prefetch=0,
            grid=grid,
            in_specs=[
                pix_spec,                               # alpha pixels (f32)
                pix_spec,                               # upsampled gamma (bf16)
                pl.BlockSpec(w1a.shape, full2d),
                pl.BlockSpec(w1g.shape, full2d),
                pl.BlockSpec(b1.shape, full2d),
                pl.BlockSpec(w2.shape, full2d),
                pl.BlockSpec(b2.shape, full2d),
                pl.BlockSpec(w3.shape, full2d),
                pl.BlockSpec(b3.shape, full2d),
            ],
            out_specs=out_spec,
        ),
        compiler_params=pltpu.CompilerParams(
            dimension_semantics=("parallel", "parallel"),
            vmem_limit_bytes=48 * 1024 * 1024),
    )(alpha_f, gamma_f, w1a, w1g, b1, w2, b2, w3, b3)


# ---------------------------------------------------------------------------
# Glue: matmul-based bilinear upsample (align_corners=True), tiling choice.
# ---------------------------------------------------------------------------
def _interp_matrix(in_sz, out_sz):
    """(out_sz, in_sz) dense interpolation matrix matching
    F.interpolate(mode='bilinear', align_corners=True) along one axis."""
    if out_sz == 1 or in_sz == 1:
        src = jnp.zeros((out_sz,), jnp.float32)
    else:
        src = jnp.arange(out_sz, dtype=jnp.float32) * ((in_sz - 1) / (out_sz - 1))
    lo = jnp.clip(jnp.floor(src).astype(jnp.int32), 0, in_sz - 1)
    hi = jnp.clip(lo + 1, 0, in_sz - 1)
    frac = src - lo.astype(jnp.float32)
    idx = jnp.arange(in_sz)[None, :]
    return ((idx == lo[:, None]).astype(jnp.float32) * (1.0 - frac)[:, None]
            + (idx == hi[:, None]).astype(jnp.float32) * frac[:, None])


def _round_up(x, m):
    return ((x + m - 1) // m) * m


def _choose_tile_px(n, p):
    tile = min(MAX_TILE_PX, _round_up(p, 128))
    # Keep >= 2 grid steps so both TensorCores get work when the batch is 1.
    if n * pl.cdiv(p, tile) < 2 and p > 128:
        tile = max(128, _round_up(pl.cdiv(p, 2), 128))
    return tile


def init_params(num_classes, key):
    """Deterministic synthetic params matching CombineBlock.__init__ shapes,
    stored pre-folded for the kernel: bf16 weights (C_out, C_in) with the BN
    scale baked in; f32 biases (C_out, 1)."""
    ks = jax.random.split(key, 6)
    c2 = num_classes * 2
    w1 = jax.random.normal(ks[0], (HIDDEN, c2), jnp.float32) * 0.1
    w2 = jax.random.normal(ks[1], (HIDDEN, HIDDEN), jnp.float32) * 0.1
    w3 = jax.random.normal(ks[2], (num_classes, HIDDEN), jnp.float32) * 0.1
    b3 = (jax.random.normal(ks[3], (num_classes,), jnp.float32) * 0.1
          ).reshape(num_classes, 1)

    def bn_fold(k, cdim):
        kw, kb, km, kv = jax.random.split(k, 4)
        gamma = 1.0 + 0.1 * jax.random.normal(kw, (cdim,), jnp.float32)
        beta = 0.1 * jax.random.normal(kb, (cdim,), jnp.float32)
        mean = 0.1 * jax.random.normal(km, (cdim,), jnp.float32)
        var = jnp.abs(jax.random.normal(kv, (cdim,), jnp.float32)) + 0.5
        scale = gamma / jnp.sqrt(var + BN_EPS)
        bias = beta - mean * scale
        return scale, bias

    s1, bias1 = bn_fold(ks[4], HIDDEN)
    s2, bias2 = bn_fold(ks[5], HIDDEN)

    # Fold BN scale into conv weights:  s*(W x) + b == (s[:,None]*W) x + b.
    w1 = w1 * s1[:, None]
    w2 = w2 * s2[:, None]
    b1 = bias1.reshape(HIDDEN, 1)
    b2 = bias2.reshape(HIDDEN, 1)

    # Split conv1 across the channel concat: W1 @ [a; g] = W1a @ a + W1g @ g.
    w1a = w1[:, :num_classes]
    w1g = w1[:, num_classes:]
    bf = lambda x: x.astype(jnp.bfloat16)  # noqa: E731
    return (bf(w1a), bf(w1g), b1, bf(w2), b2, bf(w3), b3)


@jax.jit
def combine_block(alpha_x, gamma_x, params):
    """alpha_x: (N, C, H, W) f32, gamma_x: (N, C, h, w) f32 -> (N, C, H, W) bf16."""
    n, c, h, w = alpha_x.shape
    _, _, gh, gw = gamma_x.shape

    # Bilinear upsample (align_corners=True) as two dense matmuls; the bf16
    # cast fuses into the second dot's epilogue, so full-resolution gamma
    # materializes in HBM exactly once, already in bf16.
    r_mat = _interp_matrix(gh, h)                 # (H, gh)
    c_mat = _interp_matrix(gw, w)                 # (W, gw)
    g_rows = jnp.einsum('Hh,nchw->ncHw', r_mat, gamma_x.astype(jnp.float32))
    gamma_up = jnp.einsum('ncHw,Ww->ncHW', g_rows, c_mat).astype(jnp.bfloat16)

    # NCHW -> (N, C, H*W): contiguous reshape, no transpose, no copy.
    p = h * w
    alpha_f = alpha_x.reshape(n, c, p)            # f32, cast to bf16 in-kernel
    gamma_f = gamma_up.reshape(n, c, p)           # bf16

    tile_px = _choose_tile_px(n, p)               # lane tile, multiple of 128
    y = _run_pixel_mlp(alpha_f, gamma_f, params, tile_px)   # (N, C, P) bf16
    return y.reshape(n, c, h, w)


if __name__ == "__main__":
    key = jax.random.PRNGKey(0)
    k_a, k_g, k_p = jax.random.split(key, 3)

    N, C, H, W = 2, NUM_CLASSES, 16, 16
    alpha_x = jax.random.normal(k_a, (N, C, H, W), jnp.float32)
    gamma_x = jax.random.normal(k_g, (N, C, H // 2, W // 2), jnp.float32)

    params = init_params(NUM_CLASSES, k_p)

    out = combine_block(alpha_x, gamma_x, params)
    jax.block_until_ready(out)
    assert out.shape == (N, C, H, W), out.shape
    assert out.dtype == OUT_DTYPE, out.dtype

    # Plain-JAX f32 reference (bf16-stored weights cast up; tolerance covers
    # the kernel's bf16 activation / bf16 output path).
    w1a, w1g, b1, w2, b2, w3, b3 = [p.astype(jnp.float32) for p in params]
    r_mat = _interp_matrix(H // 2, H)
    c_mat = _interp_matrix(W // 2, W)
    g_up = jnp.einsum('Hh,nchw,Ww->ncHW', r_mat, gamma_x, c_mat)
    a2 = alpha_x.reshape(N, C, H * W)
    g2 = g_up.reshape(N, C, H * W)
    h1 = (jnp.einsum('oc,ncp->nop', w1a, a2)
          + jnp.einsum('oc,ncp->nop', w1g, g2) + b1[None])
    h1 = jnp.where(h1 >= 0, h1, LEAKY_SLOPE * h1)
    h2 = jnp.einsum('oc,ncp->nop', w2, h1) + b2[None]
    h2 = jnp.where(h2 >= 0, h2, LEAKY_SLOPE * h2)
    ref = (jnp.einsum('oc,ncp->nop', w3, h2) + b3[None]).reshape(N, C, H, W)
    err = float(jnp.max(jnp.abs(out.astype(jnp.float32) - ref)))
    assert err < 1e-1, err

    print("KERNEL_OK")
</pallas_src>

<mosaic_0001>
module attributes {stable_mosaic.version = 11 : i64} {
  func.func @_combine_kernel(%arg0: i32, %arg1: i32, %arg2: memref<1x4x256xf32, #tpu.memory_space<vmem>>, %arg3: memref<1x4x256xbf16, #tpu.memory_space<vmem>>, %arg4: memref<24x4xbf16, #tpu.memory_space<vmem>>, %arg5: memref<24x4xbf16, #tpu.memory_space<vmem>>, %arg6: memref<24x1xf32, #tpu.memory_space<vmem>>, %arg7: memref<24x24xbf16, #tpu.memory_space<vmem>>, %arg8: memref<24x1xf32, #tpu.memory_space<vmem>>, %arg9: memref<4x24xbf16, #tpu.memory_space<vmem>>, %arg10: memref<4x1xf32, #tpu.memory_space<vmem>>, %arg11: memref<1x4x256xbf16, #tpu.memory_space<vmem>>) attributes {dimension_semantics = [#tpu.dimension_semantics<parallel>, #tpu.dimension_semantics<parallel>], iteration_bounds = array<i64: 2, 1>, scalar_prefetch = 0 : i64, scratch_operands = 0 : i64, tpu.core_type = #tpu.core_type<tc>, window_params = [{transform_indices = @transform_0, window_bounds = array<i64: 1, 4, 256>}, {transform_indices = @transform_1, window_bounds = array<i64: 1, 4, 256>}, {pipeline_mode = #tpu.pipeline_mode<synchronous>, transform_indices = @transform_2, window_bounds = array<i64: 24, 4>}, {pipeline_mode = #tpu.pipeline_mode<synchronous>, transform_indices = @transform_3, window_bounds = array<i64: 24, 4>}, {pipeline_mode = #tpu.pipeline_mode<synchronous>, transform_indices = @transform_4, window_bounds = array<i64: 24, 1>}, {pipeline_mode = #tpu.pipeline_mode<synchronous>, transform_indices = @transform_5, window_bounds = array<i64: 24, 24>}, {pipeline_mode = #tpu.pipeline_mode<synchronous>, transform_indices = @transform_6, window_bounds = array<i64: 24, 1>}, {pipeline_mode = #tpu.pipeline_mode<synchronous>, transform_indices = @transform_7, window_bounds = array<i64: 4, 24>}, {pipeline_mode = #tpu.pipeline_mode<synchronous>, transform_indices = @transform_8, window_bounds = array<i64: 4, 1>}, {transform_indices = @transform_9, window_bounds = array<i64: 1, 4, 256>}]} {
    %c0 = arith.constant 0 : index
    %c0_0 = arith.constant 0 : index
    %c0_1 = arith.constant 0 : index
    %0 = vector.load %arg2[%c0, %c0_0, %c0_1] : memref<1x4x256xf32, #tpu.memory_space<vmem>>, vector<1x4x256xf32>
    %1 = vector.shape_cast %0 : vector<1x4x256xf32> to vector<4x256xf32>
    %2 = arith.truncf %1 : vector<4x256xf32> to vector<4x256xbf16>
    %c0_2 = arith.constant 0 : index
    %c0_3 = arith.constant 0 : index
    %c0_4 = arith.constant 0 : index
    %3 = vector.load %arg3[%c0_2, %c0_3, %c0_4] : memref<1x4x256xbf16, #tpu.memory_space<vmem>>, vector<1x4x256xbf16>
    %4 = vector.shape_cast %3 : vector<1x4x256xbf16> to vector<4x256xbf16>
    %c0_5 = arith.constant 0 : index
    %c0_6 = arith.constant 0 : index
    %5 = vector.load %arg4[%c0_5, %c0_6] : memref<24x4xbf16, #tpu.memory_space<vmem>>, vector<24x4xbf16>
    %cst = arith.constant dense<0.000000e+00> : vector<24x256xf32>
    %6 = tpu.matmul %5, %2, %cst {dimension_numbers = #tpu.dot_dimension_numbers<[1], [0], [0], [1], [0, 0, 1, 1], [], []>} : vector<24x4xbf16>, vector<4x256xbf16>, vector<24x256xf32> -> vector<24x256xf32>
    %c0_7 = arith.constant 0 : index
    %c0_8 = arith.constant 0 : index
    %7 = vector.load %arg5[%c0_7, %c0_8] : memref<24x4xbf16, #tpu.memory_space<vmem>>, vector<24x4xbf16>
    %cst_9 = arith.constant dense<0.000000e+00> : vector<24x256xf32>
    %8 = tpu.matmul %7, %4, %cst_9 {dimension_numbers = #tpu.dot_dimension_numbers<[1], [0], [0], [1], [0, 0, 1, 1], [], []>} : vector<24x4xbf16>, vector<4x256xbf16>, vector<24x256xf32> -> vector<24x256xf32>
    %9 = arith.addf %6, %8 : vector<24x256xf32>
    %c0_10 = arith.constant 0 : index
    %c0_11 = arith.constant 0 : index
    %10 = vector.load %arg6[%c0_10, %c0_11] : memref<24x1xf32, #tpu.memory_space<vmem>>, vector<24x1xf32>
    %11 = vector.broadcast %10 : vector<24x1xf32> to vector<24x256xf32>
    %12 = arith.addf %9, %11 : vector<24x256xf32>
    %cst_12 = arith.constant 0.000000e+00 : f32
    %13 = vector.broadcast %cst_12 : f32 to vector<24x256xf32>
    %14 = arith.cmpf oge, %12, %13 : vector<24x256xf32>
    %cst_13 = arith.constant 0.00999999977 : f32
    %15 = vector.broadcast %cst_13 : f32 to vector<24x256xf32>
    %16 = arith.mulf %15, %12 : vector<24x256xf32>
    %17 = arith.select %14, %12, %16 : vector<24x256xi1>, vector<24x256xf32>
    %18 = arith.truncf %17 : vector<24x256xf32> to vector<24x256xbf16>
    %c0_14 = arith.constant 0 : index
    %c0_15 = arith.constant 0 : index
    %19 = vector.load %arg7[%c0_14, %c0_15] : memref<24x24xbf16, #tpu.memory_space<vmem>>, vector<24x24xbf16>
    %cst_16 = arith.constant dense<0.000000e+00> : vector<24x256xf32>
    %20 = tpu.matmul %19, %18, %cst_16 {dimension_numbers = #tpu.dot_dimension_numbers<[1], [0], [0], [1], [0, 0, 1, 1], [], []>} : vector<24x24xbf16>, vector<24x256xbf16>, vector<24x256xf32> -> vector<24x256xf32>
    %c0_17 = arith.constant 0 : index
    %c0_18 = arith.constant 0 : index
    %21 = vector.load %arg8[%c0_17, %c0_18] : memref<24x1xf32, #tpu.memory_space<vmem>>, vector<24x1xf32>
    %22 = vector.broadcast %21 : vector<24x1xf32> to vector<24x256xf32>
    %23 = arith.addf %20, %22 : vector<24x256xf32>
    %cst_19 = arith.constant 0.000000e+00 : f32
    %24 = vector.broadcast %cst_19 : f32 to vector<24x256xf32>
    %25 = arith.cmpf oge, %23, %24 : vector<24x256xf32>
    %cst_20 = arith.constant 0.00999999977 : f32
    %26 = vector.broadcast %cst_20 : f32 to vector<24x256xf32>
    %27 = arith.mulf %26, %23 : vector<24x256xf32>
    %28 = arith.select %25, %23, %27 : vector<24x256xi1>, vector<24x256xf32>
    %29 = arith.truncf %28 : vector<24x256xf32> to vector<24x256xbf16>
    %c0_21 = arith.constant 0 : index
    %c0_22 = arith.constant 0 : index
    %30 = vector.load %arg9[%c0_21, %c0_22] : memref<4x24xbf16, #tpu.memory_space<vmem>>, vector<4x24xbf16>
    %cst_23 = arith.constant dense<0.000000e+00> : vector<4x256xf32>
    %31 = tpu.matmul %30, %29, %cst_23 {dimension_numbers = #tpu.dot_dimension_numbers<[1], [0], [0], [1], [0, 0, 1, 1], [], []>} : vector<4x24xbf16>, vector<24x256xbf16>, vector<4x256xf32> -> vector<4x256xf32>
    %c0_24 = arith.constant 0 : index
    %c0_25 = arith.constant 0 : index
    %32 = vector.load %arg10[%c0_24, %c0_25] : memref<4x1xf32, #tpu.memory_space<vmem>>, vector<4x1xf32>
    %33 = vector.broadcast %32 : vector<4x1xf32> to vector<4x256xf32>
    %34 = arith.addf %31, %33 : vector<4x256xf32>
    %35 = arith.truncf %34 : vector<4x256xf32> to vector<4x256xbf16>
    %c0_26 = arith.constant 0 : index
    %c0_27 = arith.constant 0 : index
    %c0_28 = arith.constant 0 : index
    %36 = vector.load %arg11[%c0_26, %c0_27, %c0_28] : memref<1x4x256xbf16, #tpu.memory_space<vmem>>, vector<1x4x256xbf16>
    %37 = vector.shape_cast %36 : vector<1x4x256xbf16> to vector<4x256xbf16>
    %38 = vector.shape_cast %35 : vector<4x256xbf16> to vector<1x4x256xbf16>
    tpu.vector_store %arg11[%c0_26, %c0_27, %c0_28], %38 {strides = array<i32>} : memref<1x4x256xbf16, #tpu.memory_space<vmem>>, vector<1x4x256xbf16>,
    return
  }
  func.func @transform_0(%arg0: i32, %arg1: i32) -> (i32, i32, i32) {
    %c0_i32 = arith.constant 0 : i32
    %c0_i32_0 = arith.constant 0 : i32
    return %arg0, %c0_i32, %arg1 : i32, i32, i32
  }
  func.func @transform_1(%arg0: i32, %arg1: i32) -> (i32, i32, i32) {
    %c0_i32 = arith.constant 0 : i32
    %c0_i32_0 = arith.constant 0 : i32
    return %arg0, %c0_i32, %arg1 : i32, i32, i32
  }
  func.func @transform_2(%arg0: i32, %arg1: i32) -> (i32, i32) {
    %c0_i32 = arith.constant 0 : i32
    %c0_i32_0 = arith.constant 0 : i32
    %c0_i32_1 = arith.constant 0 : i32
    return %c0_i32, %c0_i32_0 : i32, i32
  }
  func.func @transform_3(%arg0: i32, %arg1: i32) -> (i32, i32) {
    %c0_i32 = arith.constant 0 : i32
    %c0_i32_0 = arith.constant 0 : i32
    %c0_i32_1 = arith.constant 0 : i32
    return %c0_i32, %c0_i32_0 : i32, i32
  }
  func.func @transform_4(%arg0: i32, %arg1: i32) -> (i32, i32) {
    %c0_i32 = arith.constant 0 : i32
    %c0_i32_0 = arith.constant 0 : i32
    %c0_i32_1 = arith.constant 0 : i32
    return %c0_i32, %c0_i32_0 : i32, i32
  }
  func.func @transform_5(%arg0: i32, %arg1: i32) -> (i32, i32) {
    %c0_i32 = arith.constant 0 : i32
    %c0_i32_0 = arith.constant 0 : i32
    %c0_i32_1 = arith.constant 0 : i32
    return %c0_i32, %c0_i32_0 : i32, i32
  }
  func.func @transform_6(%arg0: i32, %arg1: i32) -> (i32, i32) {
    %c0_i32 = arith.constant 0 : i32
    %c0_i32_0 = arith.constant 0 : i32
    %c0_i32_1 = arith.constant 0 : i32
    return %c0_i32, %c0_i32_0 : i32, i32
  }
  func.func @transform_7(%arg0: i32, %arg1: i32) -> (i32, i32) {
    %c0_i32 = arith.constant 0 : i32
    %c0_i32_0 = arith.constant 0 : i32
    %c0_i32_1 = arith.constant 0 : i32
    return %c0_i32, %c0_i32_0 : i32, i32
  }
  func.func @transform_8(%arg0: i32, %arg1: i32) -> (i32, i32) {
    %c0_i32 = arith.constant 0 : i32
    %c0_i32_0 = arith.constant 0 : i32
    %c0_i32_1 = arith.constant 0 : i32
    return %c0_i32, %c0_i32_0 : i32, i32
  }
  func.func @transform_9(%arg0: i32, %arg1: i32) -> (i32, i32, i32) {
    %c0_i32 = arith.constant 0 : i32
    %c0_i32_0 = arith.constant 0 : i32
    return %arg0, %c0_i32, %arg1 : i32, i32, i32
  }
}

</mosaic_0001>

<bundles_post_ra>
// kernel: combine_block.1
= control target key start
LH: loop header
LB: loop body
LE: loop exit
PB: predicated region body
PF: predicated region fallthrough
CT: control target
= control target key end

     0   :  { %s991_s30 = smov 0   ;;  %s993_s10 = smov 0   ;;  %s1100_s0 = inlined_call_operand.vmem [shape: f32[2,4,256], index: 0, kind: input, shape index: {}]   ;;  %s1101_s1 = inlined_call_operand.vmem [shape: bf16[2,4,256], index: 1, kind: input, shape index: {}]   ;;  %s1102_s2 = inlined_call_operand.vmem [shape: bf16[24,4], index: 2, kind: input, shape index: {}]   ;;  %s1103_s3 = inlined_call_operand.vmem [shape: bf16[24,4], index: 3, kind: input, shape index: {}]   ;;  %s1104_s4 = inlined_call_operand.vmem [shape: f32[24,1], index: 4, kind: input, shape index: {}]   ;;  %s1105_s5 = inlined_call_operand.vmem [shape: bf16[24,24], index: 5, kind: input, shape index: {}]   ;;  %s1106_s6 = inlined_call_operand.vmem [shape: f32[24,1], index: 6, kind: input, shape index: {}]   ;;  %s1107_s7 = inlined_call_operand.vmem [shape: bf16[4,24], index: 7, kind: input, shape index: {}]   ;;  %s1108_s8 = inlined_call_operand.vmem [shape: f32[4,1], index: 8, kind: input, shape index: {}]   ;;  %s1109_s9 = inlined_call_operand.vmem [shape: bf16[2,4,256], index: 9, kind: output, shape index: {}]  }
   0x1   :  { %s995_s11 = smov 0  }
   0x2 LB: > { %s31_s12 = sadd.s32 1, %s934_s10  ;;  %p847_p0 = scmp.ge.s32.totalorder %s938_s11, 1  ;;  %s938_s11 = sphi %s995_s11, %s19_s11   ;;  %s934_s10 = sphi %s993_s10, %s1111_s10   ;;  %s930_s30 = sphi %s991_s30, %s1110_s30  }
   0x3   : > { %p33_p1 = scmp.ge.s32.totalorder %s31_s12, 2  ;;  %p325_p2 = scmp.lt.s32.totalorder %s938_s11, 3 }
   0x5   : > { %s1113_s12 = smov (%p33_p1, %s31_s12), 0  ;;  %p326_p3 = pnand %p847_p0, %p325_p2 }
   0x6   : > { %p379_p4 = scmp.lt.s32.totalorder (!%p326_p3), %s930_s30, 1 }
   0x7   : > { %329 = sbr.rel (%p326_p3) target bundleno = 493 (0x1ed), region = 56 }
   0xc   : > { %v940_v0 = vmov 0   ;;  %v543_v1 = vld [vmem:[%s1104_s4 + $0x10] sm:$0xff]  ;;  %s1115_s30 = smov (!%p379_p4, %s930_s30), 1  ;;  %v541_v3 = vld [vmem:[%s1104_s4] sm:$0xff]  ;;  %v542_v4 = vld [vmem:[%s1104_s4 + $0x8] sm:$0xff]  ;;  %vm444_vm0 = vcmask 1041408  }
   0xd   : > { %913 = vset.pattern.permute.xlu0 %v940_v0  ;;  %914 = vset.pattern.permute.xlu1 %v940_v0  ;;  %s882_s15 = sshll.u32 %s1115_s30, 3  ;;  %s883_s19 = sshll.u32 %s1115_s30, 2  ;;  %v689_v10 = vld [vmem:[%s1108_s8] sm:$0xf]  ;;  %v592_v14 = vld [vmem:[%s1106_s6 + $0x10] sm:$0xff]  ;;  %vm437_vm1 = vcmask 31744  }
   0xe   : > { %556 = vperm.xlu0 %913, %v543_v1   ;;  %915 = vset.pattern.permute.xlu2 %v940_v0  ;;  %s386_s18 = scalar_lea.vmem %s1100_s0, %s882_s15  ;;  %s396_s24 = scalar_lea.vmem %s1101_s1, %s883_s19  ;;  %v885_v13 = vld [vmem:[%s1102_s2] sm:$0xff]  ;;  %v421_v20 = vld [vmem:[%s1102_s2 + $0x8] sm:$0xf]  ;;  %vm623_vm4 = vcmask 1043456   ;;  %vm616_vm9 = vcmask 195584  }
   0xf   : > { %v409_v2 = vld [vmem:[%s386_s18] sm:$0xff]  ;;  %551 = vperm.xlu1 %914, %v542_v4   ;;  %v490_v21 = vunpack.c.l.b16 %v421_v20  ;;  %v424_v22 = vld [vmem:[%s1103_s3 + $0x8] sm:$0xf]  ;;  %s406_s18 = scalar_lea.vmem %s1109_s9, %s883_s19 }
  0x10   : > { %411 = vst [vmem:[#allocation1] ss:$2 sm:$0xff] %v409_v2  ;;  %v418_v5 = vld [vmem:[%s396_s24] sm:$0xf]  ;;  %v430_v24 = vunpack.c.l.b16 %v424_v22  ;;  %v591_v4 = vld [vmem:[%s1106_s6 + $0x8] sm:$0xff] }
  0x11   : > { %v886_v19 = vld [vmem:[%s1103_s3] sm:$0xff]  ;;  %v492_v23 = vpack.c.b16 %v490_v21, %v490_v21 }
  0x12   : > { %v432_v25 = vpack.c.b16 %v430_v24, %v430_v24  ;;  %v590_v49 = vld [vmem:[%s1106_s6] sm:$0xff] }
  0x13   : > { %595 = vperm.xlu2 %915, %v590_v49  }
  0x16   : > { %546 = vperm.xlu0 %913, %v541_v3  }
  0x17   : > { %v412_v6 = vld.sshfl [vmem:[#allocation1] sm:$0xff pattern:$0x75316420]  ;;  %v413_v7 = vld.sshfl [vmem:[#allocation1 + $0x8] sm:$0xff pattern:$0x75316420]  ;;  %605 = vperm.xlu1 %914, %v592_v14  }
  0x18   : > { %v416_v8 = vpack.c.bf16 %v412_v6, %v412_v6  ;;  %v417_v9 = vpack.c.bf16 %v413_v7, %v413_v7  ;;  %434 = vst [vmem:[#allocation1] ss:$4 sm:$0xff] %v418_v5  ;;  %v589_v14 = vld [vmem:[%s1105_s5 + $0x8] sm:$0xf] }
  0x1a   : > { %v500_v11 = vsel %vm444_vm0, %v416_v8, 0  ;;  %v503_v12 = vsel %vm444_vm0, %v417_v9, 0 }
  0x1b   : > { %512 = vmatpush.bf16.msra.mxu2 %v500_v11  ;;  %530 = vmatpush.bf16.msra.mxu3 %v503_v12 }
  0x1c   : > { %600 = vperm.xlu2 %915, %v591_v4  }
  0x1e   : > { %692 = vperm.xlu0 %913, %v689_v10   ;;  %866 = vmatmul.msk.bf16.vlgmr.msra.gmra.mxu2 %vm437_vm1, %v885_v13 }
  0x1f   : > { %868 = vmatmul.msk.bf16.vlgmr.msra.gmra.mxu3 %vm437_vm1, %v885_v13  ;;  %v435_v15 = vld.sshfl [vmem:[#allocation1] sm:$0xff pattern:$0x73625140]  ;;  %v436_v16 = vld.sshfl [vmem:[#allocation1 + $0x8] sm:$0xff pattern:$0x73625140] }
  0x20   : > { %v445_v17 = vsel %vm444_vm0, %v435_v15, 0  ;;  %v447_v18 = vsel %vm444_vm0, %v436_v16, 0  ;;  %v887_v13 = vld [vmem:[%s1105_s5] sm:$0xff]  ;;  %v613_v15 = vunpack.c.l.b16 %v589_v14 }
  0x21   : > { %456 = vmatpush.bf16.msra.mxu0 %v445_v17  ;;  %474 = vmatpush.bf16.msra.mxu1 %v447_v18 }
  0x22   : > { %v615_v16 = vpack.c.b16 %v613_v15, %v613_v15 }
  0x24   : > { %858 = vmatmul.msk.bf16.vlgmr.msra.gmra.mxu0 %vm437_vm1, %v886_v19  ;;  %860 = vmatmul.msk.bf16.vlgmr.msra.gmra.mxu1 %vm437_vm1, %v886_v19 }
  0x2e   : > { %867 = vmatmul.msk.bf16.gmra.mxu2 %vm437_vm1, %v492_v23 }
  0x2f   : > { %869 = vmatmul.msk.bf16.gmra.mxu3 %vm437_vm1, %v492_v23 }
  0x34   : > { %859 = vmatmul.msk.bf16.gmra.mxu0 %vm437_vm1, %v432_v25  ;;  %861 = vmatmul.msk.bf16.gmra.mxu1 %vm437_vm1, %v432_v25 }
  0x6d   : > { %v596_v19 = vpop.permute.xlu2 %595 }
  0x76   : > { %v601_v22 = vpop.permute.xlu2 %600 }
  0x80   : > { %v557_v30 = vpop.permute.xlu0 %556 }
  0x81   : > { %v552_v37 = vpop.permute.xlu1 %551 }
  0x88   : > { %v547_v44 = vpop.permute.xlu0 %546 }
  0x89   : > { %v606_v23 = vpop.permute.xlu1 %605 }
  0xa1   : > { %v458_v26 = vpop.f32.mrf.mxu0  ;;  %v476_v27 = vpop.f32.mrf.mxu1 }
  0xa2   : > { %v514_v28 = vpop.f32.mrf.mxu2  ;;  %v532_v29 = vpop.f32.mrf.mxu3 }
  0xa3   : > { %v515_v40 = vadd.f32 %v514_v28, %v458_v26  ;;  %v533_v41 = vadd.f32 %v532_v29, %v476_v27 }
  0xa5   : > { %v559_v52 = vadd.f32 %v547_v44, %v515_v40  ;;  %v560_v53 = vadd.f32 %v547_v44, %v533_v41 }
  0xa7   : > { %v571_v62 = vmul.f32 0.01, %v559_v52  ;;  %v572_v63 = vmul.f32 0.01, %v560_v53  ;;  %vm565_vm7 = vcmp.ge.f32.partialorder %v559_v52, 0.0  ;;  %vm566_vm8 = vcmp.ge.f32.partialorder %v560_v53, 0.0 }
  0xa9   : > { %v460_v31 = vpop.f32.mrf.mxu0  ;;  %v478_v32 = vpop.f32.mrf.mxu1  ;;  %v577_v9 = vsel %vm565_vm7, %v559_v52, %v571_v62  ;;  %v578_v10 = vsel %vm566_vm8, %v560_v53, %v572_v63  ;;  %v688_v52 = vld [vmem:[%s1107_s7] sm:$0x3] }
  0xaa   : > { %v516_v33 = vpop.f32.mrf.mxu2  ;;  %v534_v34 = vpop.f32.mrf.mxu3 }
  0xab   : > { %v517_v35 = vadd.f32 %v516_v33, %v460_v31  ;;  %v535_v36 = vadd.f32 %v534_v34, %v478_v32  ;;  %v693_v53 = vpop.permute.xlu0 %692 }
  0xad   : > { %v561_v47 = vadd.f32 %v552_v37, %v517_v35  ;;  %v562_v48 = vadd.f32 %v552_v37, %v535_v36 }
  0xaf   : > { %v573_v56 = vmul.f32 0.01, %v561_v47  ;;  %v574_v57 = vmul.f32 0.01, %v562_v48  ;;  %vm567_vm5 = vcmp.ge.f32.partialorder %v561_v47, 0.0  ;;  %vm568_vm6 = vcmp.ge.f32.partialorder %v562_v48, 0.0 }
  0xb1   : > { %v463_v38 = vpop.f32.mrf.mxu0  ;;  %v481_v39 = vpop.f32.mrf.mxu1  ;;  %v579_v7 = vsel %vm567_vm5, %v561_v47, %v573_v56  ;;  %v580_v8 = vsel %vm568_vm6, %v562_v48, %v574_v57 }
  0xb2   : > { %v519_v42 = vpop.f32.mrf.mxu2  ;;  %v537_v43 = vpop.f32.mrf.mxu3  ;;  %v583_v11 = vpack.c.bf16 %v579_v7, %v577_v9  ;;  %v584_v12 = vpack.c.bf16 %v580_v8, %v578_v10 }
  0xb3   : > { %v520_v45 = vadd.f32 %v519_v42, %v463_v38  ;;  %v538_v46 = vadd.f32 %v537_v43, %v481_v39 }
  0xb5   : > { %v563_v50 = vadd.f32 %v557_v30, %v520_v45  ;;  %v564_v51 = vadd.f32 %v557_v30, %v538_v46 }
  0xb7   : > { %v575_v54 = vmul.f32 0.01, %v563_v50  ;;  %v576_v55 = vmul.f32 0.01, %v564_v51  ;;  %vm569_vm2 = vcmp.ge.f32.partialorder %v563_v50, 0.0  ;;  %vm570_vm3 = vcmp.ge.f32.partialorder %v564_v51, 0.0 }
  0xb9   : > { %v465_v58 = vpop.f32.mrf.mxu0  ;;  %v483_v59 = vpop.f32.mrf.mxu1  ;;  %v581_v60 = vsel %vm569_vm2, %v563_v50, %v575_v54  ;;  %v582_v61 = vsel %vm570_vm3, %v564_v51, %v576_v55 }
  0xba   : > { %v521_v0 = vpop.f32.mrf.mxu2  ;;  %v539_v1 = vpop.f32.mrf.mxu3  ;;  %v585_v2 = vpack.c.bf16 %v581_v60, %v581_v60  ;;  %v586_v3 = vpack.c.bf16 %v582_v61, %v582_v61 }
  0xbc   : > { %v625_v5 = vsel %vm623_vm4, %v585_v2, 0  ;;  %v628_v6 = vsel %vm623_vm4, %v586_v3, 0 }
  0xbd   : > { %636 = vmatpush.bf16.msrb.mxu0 %v625_v5  ;;  %654 = vmatpush.bf16.msrb.mxu1 %v628_v6 }
  0xc1   : > { %637 = vmatpush.bf16.msrb.mxu0 %v583_v11  ;;  %655 = vmatpush.bf16.msrb.mxu1 %v584_v12 }
  0xc4   : > { %874 = vmatmul.msk.bf16.vlgmr.msrb.gmra.mxu0 %vm616_vm9, %v887_v13  ;;  %876 = vmatmul.msk.bf16.vlgmr.msrb.gmra.mxu1 %vm616_vm9, %v887_v13 }
  0xd4   : > { %875 = vmatmul.msk.bf16.gmra.mxu0 %vm616_vm9, %v615_v16  ;;  %877 = vmatmul.msk.bf16.gmra.mxu1 %vm616_vm9, %v615_v16 }
 0x141   : > { %v639_v17 = vpop.f32.mrf.mxu0  ;;  %v657_v18 = vpop.f32.mrf.mxu1 }
 0x142   : > { %v640_v30 = vadd.f32 %v639_v17, %v596_v19  ;;  %v658_v31 = vadd.f32 %v657_v18, %v596_v19 }
 0x144   : > { %v672_v38 = vmul.f32 0.01, %v640_v30  ;;  %v673_v39 = vmul.f32 0.01, %v658_v31  ;;  %vm666_vm14 = vcmp.ge.f32.partialorder %v640_v30, 0.0  ;;  %vm667_vm15 = vcmp.ge.f32.partialorder %v658_v31, 0.0 }
 0x146   : > { %v678_v48 = vsel %vm666_vm14, %v640_v30, %v672_v38  ;;  %v679_v49 = vsel %vm667_vm15, %v658_v31, %v673_v39 }
 0x149   : > { %v641_v20 = vpop.f32.mrf.mxu0  ;;  %v659_v21 = vpop.f32.mrf.mxu1 }
 0x14a   : > { %v642_v24 = vadd.f32 %v641_v20, %v601_v22  ;;  %v660_v25 = vadd.f32 %v659_v21, %v601_v22 }
 0x14c   : > { %v674_v34 = vmul.f32 0.01, %v642_v24  ;;  %v675_v35 = vmul.f32 0.01, %v660_v25  ;;  %vm668_vm12 = vcmp.ge.f32.partialorder %v642_v24, 0.0  ;;  %vm669_vm13 = vcmp.ge.f32.partialorder %v660_v25, 0.0 }
 0x14e   : > { %v680_v46 = vsel %vm668_vm12, %v642_v24, %v674_v34  ;;  %v681_v47 = vsel %vm669_vm13, %v660_v25, %v675_v35 }
 0x14f   : > { %v684_v50 = vpack.c.bf16 %v680_v46, %v678_v48  ;;  %v685_v51 = vpack.c.bf16 %v681_v47, %v679_v49 }
 0x151   : > { %v644_v26 = vpop.f32.mrf.mxu0  ;;  %v662_v27 = vpop.f32.mrf.mxu1 }
 0x152   : > { %v645_v28 = vadd.f32 %v644_v26, %v606_v23  ;;  %v663_v29 = vadd.f32 %v662_v27, %v606_v23 }
 0x154   : > { %v676_v32 = vmul.f32 0.01, %v645_v28  ;;  %v677_v33 = vmul.f32 0.01, %v663_v29  ;;  %vm670_vm10 = vcmp.ge.f32.partialorder %v645_v28, 0.0  ;;  %vm671_vm11 = vcmp.ge.f32.partialorder %v663_v29, 0.0 }
 0x156   : > { %v682_v36 = vsel %vm670_vm10, %v645_v28, %v676_v32  ;;  %v683_v37 = vsel %vm671_vm11, %v663_v29, %v677_v33 }
 0x157   : > { %v686_v40 = vpack.c.bf16 %v682_v36, %v682_v36  ;;  %v687_v41 = vpack.c.bf16 %v683_v37, %v683_v37 }
 0x159   : > { %v646_v42 = vpop.f32.mrf.mxu0  ;;  %v664_v43 = vpop.f32.mrf.mxu1  ;;  %v699_v44 = vsel %vm623_vm4, %v686_v40, 0  ;;  %v702_v45 = vsel %vm623_vm4, %v687_v41, 0 }
 0x15a   : > { %710 = vmatpush.bf16.msrb.mxu2 %v699_v44  ;;  %723 = vmatpush.bf16.msrb.mxu3 %v702_v45 }
 0x15e   : > { %711 = vmatpush.bf16.msrb.mxu2 %v684_v50  ;;  %724 = vmatpush.bf16.msrb.mxu3 %v685_v51 }
 0x161   : > { %878 = vmatmul.msk.bf16.vlgmr.msrb.gmra.mxu2 %vm616_vm9, %v688_v52  ;;  %879 = vmatmul.msk.bf16.vlgmr.msrb.gmra.mxu3 %vm616_vm9, %v688_v52 }
 0x1e4   : > { %v713_v54 = vpop.f32.mrf.mxu2  ;;  %v726_v55 = vpop.f32.mrf.mxu3 }
 0x1e5   : > { %v714_v56 = vadd.f32 %v713_v54, %v693_v53  ;;  %v727_v57 = vadd.f32 %v726_v55, %v693_v53 }
 0x1e7   : > { %v730_v58 = vpack.c.bf16 %v727_v57, %v714_v56 }
 0x1e9   : > { %v732_v59 = vrot.slane %v730_v58, 2 }
 0x1eb   : > { %v735_v60 = vsel %vm444_vm0, %v730_v58, %v732_v59 }
 0x1ec   : > { %737 = vst [vmem:[%s406_s18] sm:$0xf] %v735_v60  ;;  %v715_v61 = vpop.f32.mrf.mxu2  ;;  %v728_v62 = vpop.f32.mrf.mxu3 }
 0x1ed PF: > { %s19_s11 = sadd.s32 1, %s938_s11   ;;  %s1110_s30 = smov %s934_s10 }
 0x1ee   : > { %p16_p5 = scmp.ge.s32.totalorder %s19_s11, 4   ;;  %s1111_s10 = smov %s1113_s12 }
 0x1f0   :  { %18 = sbr.rel (!%p16_p5) target bundleno = 2 (0x2), region = 89 }

</bundles_post_ra>
